<compile_context>
chip_gen: v6e
topology: v6e:2x2x1
jax: 0.10.0
libtpu: 0.0.40
codegen_flags: <defaults>
</compile_context>

<pallas_src>
import jax
import jax.numpy as jnp
from jax import lax
from jax.experimental import pallas as pl
from jax.experimental.pallas import tpu as pltpu


_INV_SQRT_2 = 0.7071067811865475
_SQRT_2_OVER_PI = 0.7978845608028654


def _gelu_exact(x):
    # nn.GELU() default (exact, erf-based).
    return 0.5 * x * (1.0 + lax.erf(x * _INV_SQRT_2))


def _gelu_tanh(x):
    # tanh approximation -> transcendental goes to the EUP slot (perf review).
    return 0.5 * x * (1.0 + jnp.tanh(_SQRT_2_OVER_PI * (x + 0.044715 * x * x * x)))


def _round_up(x, m):
    return ((x + m - 1) // m) * m


def _packing_for_dim(d):
    """Choose (d_pad, p) so d_eff = p * d_pad is a multiple of 128 (lane-dense)."""
    if d % 128 == 0:
        return d, 1
    if 128 % d == 0:
        return d, 128 // d
    if d < 128:
        d_pad = 1 << (d - 1).bit_length()      # next pow2 -> divides 128
        return d_pad, 128 // d_pad
    return _round_up(d, 128), 1


def pack_side_chain_resnet_params(w1_t, b1, w2_t, b2):
    """Precompute the lane-packed (block-diagonal) weights ONCE per layer.

    w*_t are (d_in, d_out), i.e. the transpose of PyTorch nn.Linear.weight.
    Hoisted out of the per-iteration wrapper per the perf review: rebuilding the
    (d_eff, d_eff) kron blocks on every resnet iteration is an avoidable,
    never-hidden HBM round trip.
    """
    d = int(w1_t.shape[0])
    d_pad, p = _packing_for_dim(d)

    def pad_w(w):
        return jnp.pad(w, ((0, d_pad - d), (0, d_pad - d))) if d_pad != d else w

    def pad_b(b):
        return jnp.pad(b, (0, d_pad - d)) if d_pad != d else b

    w1p, w2p = pad_w(w1_t), pad_w(w2_t)
    b1p, b2p = pad_b(b1), pad_b(b2)
    if p > 1:
        eye = jnp.eye(p, dtype=w1p.dtype)
        w1p = jnp.kron(eye, w1p)               # block-diagonal (d_eff, d_eff)
        w2p = jnp.kron(eye, w2p)
        b1p = jnp.tile(b1p, p)
        b2p = jnp.tile(b2p, p)
    d_eff = p * d_pad
    # NOTE(v5e): the kron inflates K so (p-1)/p of MXU MACs multiply zeros; on
    # v6e/v7x this is hidden under the HBM roofline, so we keep the simple form.
    return dict(w1=w1p, b1=b1p.reshape(1, d_eff),
                w2=w2p, b2=b2p.reshape(1, d_eff),
                d=d, d_pad=d_pad, p=p, d_eff=d_eff)


def _make_resnet_iter_kernel(approximate_gelu):
    gelu = _gelu_tanh if approximate_gelu else _gelu_exact

    def kernel(s_ref, w1_ref, b1_ref, w2_ref, b2_ref, o_ref):
        s = s_ref[...]
        # GELU in f32 for transcendental accuracy; dot operands in the weights'
        # native dtype (no per-step f32 upcast of the constant weight blocks).
        x = gelu(s.astype(jnp.float32))
        x = jnp.dot(x.astype(w1_ref.dtype), w1_ref[...],
                    preferred_element_type=jnp.float32)
        x = gelu(x + b1_ref[...].astype(jnp.float32))
        x = jnp.dot(x.astype(w2_ref.dtype), w2_ref[...],
                    preferred_element_type=jnp.float32)
        x = x + b2_ref[...].astype(jnp.float32)
        # residual(s, x): s + x (same values in train and eval mode)
        o_ref[...] = (s.astype(jnp.float32) + x).astype(o_ref.dtype)

    return kernel


def side_chain_angle_resnet_iteration(s, packed_params, *, block_rows=8192,
                                      approximate_gelu=False):
    """One side-chain-angle resnet iteration: s + L2(GELU(L1(GELU(s))))."""
    d = packed_params["d"]
    d_pad = packed_params["d_pad"]
    p = packed_params["p"]
    d_eff = packed_params["d_eff"]
    if s.shape[-1] != d:
        raise ValueError(f"feature dim {s.shape[-1]} != packed params dim {d}")

    orig_shape = s.shape
    s2d = s.reshape(-1, d)                    # free (contiguous) reshape
    n = s2d.shape[0]

    rows_packed = -(-n // p)
    n_fold = rows_packed * p
    pad_rows = n_fold - n
    pad_feat = d_pad - d
    if pad_rows or pad_feat:
        # Fallback paths only: the feature pad keeps the kernel lane-dense for
        # d_hid values that don't divide 128; the row pad handles ragged tails.
        # TODO(synk): a fully copy-free ragged tail needs in-kernel masked DMA
        # of the last partial pack; the common (divisible) path has no copies.
        s2d = jnp.pad(s2d, ((0, pad_rows), (0, pad_feat)))
    s_packed = s2d.reshape(rows_packed, d_eff)   # free reshape

    itemsize = jnp.dtype(s.dtype).itemsize
    w_itemsize = jnp.dtype(packed_params["w1"].dtype).itemsize

    # Row tile: biggest block (<= ~4 MiB) that fits; never split small problems
    # into extra serial grid steps (v5e/v6e have a single TensorCore).
    max_block_bytes = 4 * 1024 * 1024
    cap = max(8, ((max_block_bytes // (d_eff * itemsize)) // 8) * 8)
    cap = min(cap, int(block_rows))
    br = rows_packed if rows_packed <= cap else cap
    grid = (pl.cdiv(rows_packed, br),)

    # Explicit scoped-VMEM budget: 2x in + 2x out blocks, double-buffered
    # weights, ~4 live f32 elementwise temporaries, plus margin.  Clamped to
    # [32 MiB, 50 MiB]: above v5e's 16 MiB default, below v7x's 64 MiB physical.
    blk_bytes = br * d_eff * itemsize
    est = (4 * blk_bytes + 4 * d_eff * d_eff * w_itemsize
           + 4 * br * d_eff * 4 + (2 << 20))
    vmem_limit = int(min(max(est, 32 << 20), 50 << 20))

    cost = pl.CostEstimate(
        flops=4 * rows_packed * d_eff * d_eff,           # two (br,K)x(K,N) matmuls
        transcendentals=2 * rows_packed * d_eff,         # two GELUs
        bytes_accessed=(2 * rows_packed * d_eff * itemsize
                        + 2 * d_eff * d_eff * w_itemsize
                        + 2 * d_eff * w_itemsize),
    )

    kernel = _make_resnet_iter_kernel(approximate_gelu)
    out = pl.pallas_call(
        kernel,
        out_shape=jax.ShapeDtypeStruct((rows_packed, d_eff), s.dtype),
        grid_spec=pltpu.PrefetchScalarGridSpec(
            num_scalar_prefetch=0,
            grid=grid,
            in_specs=[
                # TODO(synk): consider pipeline_mode=pl.Buffered(3) here if a
                # trace ever shows exposed DMA after the EUP / dtype changes.
                pl.BlockSpec((br, d_eff), lambda i: (i, 0)),      # activations
                pl.BlockSpec((d_eff, d_eff), lambda i: (0, 0)),   # W1 (block-diag)
                pl.BlockSpec((1, d_eff), lambda i: (0, 0)),       # b1
                pl.BlockSpec((d_eff, d_eff), lambda i: (0, 0)),   # W2 (block-diag)
                pl.BlockSpec((1, d_eff), lambda i: (0, 0)),       # b2
            ],
            out_specs=pl.BlockSpec((br, d_eff), lambda i: (i, 0)),
        ),
        compiler_params=pltpu.CompilerParams(
            # TODO(synk): on v7x confirm "parallel" shards the row axis across
            # both TensorCores; if not, switch to CORE_PARALLEL / core_map.
            dimension_semantics=("parallel",),
            vmem_limit_bytes=vmem_limit,
        ),
        cost_estimate=cost,
    )(s_packed, packed_params["w1"], packed_params["b1"],
      packed_params["w2"], packed_params["b2"])

    out = out.reshape(n_fold, d_pad)          # free reshape
    if pad_rows:
        out = out[:n]
    if pad_feat:
        out = out[:, :d]
    return out.reshape(orig_shape)


def side_chain_angle_resnet_iteration_raw(s, w1_t, b1, w2_t, b2, **kwargs):
    """Convenience one-shot entry point (packs the weights on the fly)."""
    return side_chain_angle_resnet_iteration(
        s, pack_side_chain_resnet_params(w1_t, b1, w2_t, b2), **kwargs)


def _reference(s, w1_t, b1, w2_t, b2, approximate_gelu=False):
    gelu = _gelu_tanh if approximate_gelu else _gelu_exact
    x = gelu(s)
    x = x @ w1_t + b1
    x = gelu(x)
    x = x @ w2_t + b2
    return s + x


if __name__ == "__main__":
    key = jax.random.PRNGKey(0)
    ks, kw1, kb1, kw2, ks2, kw3, kb3, kw4 = jax.random.split(key, 8)

    # ---- d_hid = 32 (nominal hidden size of the module) ----------------------
    d = 32
    # PyTorch nn.Linear stores weight as (d_out, d_in); we build (d_in, d_out)
    # directly (the transpose used by y = x @ W^T + b).  linear_2 uses
    # init='final' (zero weight) in the module; small nonzero values are used
    # here so the kernel hot path is actually exercised.
    w1_t = jax.random.normal(kw1, (d, d), dtype=jnp.float32) * 0.1
    b1 = jax.random.normal(kb1, (d,), dtype=jnp.float32) * 0.01
    w2_t = jax.random.normal(kw2, (d, d), dtype=jnp.float32) * 0.1
    b2 = jnp.zeros((d,), dtype=jnp.float32)
    packed = pack_side_chain_resnet_params(w1_t, b1, w2_t, b2)   # hoisted, reused

    # Case A: nominal small shape, exact (erf) GELU = module semantics.
    s_a = jax.random.normal(ks, (2, 8, d), dtype=jnp.float32)
    out_a = jax.block_until_ready(side_chain_angle_resnet_iteration(s_a, packed))
    ref_a = _reference(s_a, w1_t, b1, w2_t, b2)
    assert out_a.shape == s_a.shape and out_a.dtype == s_a.dtype
    assert jnp.allclose(out_a, ref_a, atol=1e-5, rtol=1e-5), (
        float(jnp.max(jnp.abs(out_a - ref_a))))

    # Case B: ragged row count -> tail pad / partial-pack fallback path.
    s_b = jax.random.normal(ks2, (3, 13, d), dtype=jnp.float32)
    out_b = jax.block_until_ready(side_chain_angle_resnet_iteration(s_b, packed))
    ref_b = _reference(s_b, w1_t, b1, w2_t, b2)
    assert out_b.shape == s_b.shape and out_b.dtype == s_b.dtype
    assert jnp.allclose(out_b, ref_b, atol=1e-5, rtol=1e-5), (
        float(jnp.max(jnp.abs(out_b - ref_b))))

    # Case C: tanh-approximate GELU (EUP path), checked against a tanh reference.
    out_c = jax.block_until_ready(
        side_chain_angle_resnet_iteration(s_a, packed, approximate_gelu=True))
    ref_c = _reference(s_a, w1_t, b1, w2_t, b2, approximate_gelu=True)
    assert jnp.allclose(out_c, ref_c, atol=1e-5, rtol=1e-5), (
        float(jnp.max(jnp.abs(out_c - ref_c))))

    # Case D: d_hid that does not divide 128 -> feature-pad fallback stays
    # lane-dense (d=48 is padded to 64, packed 2 rows per 128 lanes).
    d48 = 48
    w3_t = jax.random.normal(kw3, (d48, d48), dtype=jnp.float32) * 0.1
    b3 = jax.random.normal(kb3, (d48,), dtype=jnp.float32) * 0.01
    w4_t = jax.random.normal(kw4, (d48, d48), dtype=jnp.float32) * 0.1
    b4 = jnp.zeros((d48,), dtype=jnp.float32)
    s_d = jax.random.normal(ks, (2, 8, d48), dtype=jnp.float32)
    out_d = jax.block_until_ready(
        side_chain_angle_resnet_iteration_raw(s_d, w3_t, b3, w4_t, b4))
    ref_d = _reference(s_d, w3_t, b3, w4_t, b4)
    assert out_d.shape == s_d.shape and out_d.dtype == s_d.dtype
    assert jnp.allclose(out_d, ref_d, atol=1e-5, rtol=1e-5), (
        float(jnp.max(jnp.abs(out_d - ref_d))))

    print("KERNEL_OK")
</pallas_src>

<mosaic_0001>
module attributes {stable_mosaic.version = 11 : i64} {
  func.func @kernel(%arg0: i32, %arg1: memref<4x128xf32, #tpu.memory_space<vmem>>, %arg2: memref<128x128xf32, #tpu.memory_space<vmem>>, %arg3: memref<1x128xf32, #tpu.memory_space<vmem>>, %arg4: memref<128x128xf32, #tpu.memory_space<vmem>>, %arg5: memref<1x128xf32, #tpu.memory_space<vmem>>, %arg6: memref<4x128xf32, #tpu.memory_space<vmem>>) attributes {dimension_semantics = [#tpu.dimension_semantics<parallel>], iteration_bounds = array<i64: 1>, scalar_prefetch = 0 : i64, scratch_operands = 0 : i64, tpu.core_type = #tpu.core_type<tc>, window_params = [{transform_indices = @transform_0, window_bounds = array<i64: 4, 128>}, {pipeline_mode = #tpu.pipeline_mode<synchronous>, transform_indices = @transform_1, window_bounds = array<i64: 128, 128>}, {pipeline_mode = #tpu.pipeline_mode<synchronous>, transform_indices = @transform_2, window_bounds = array<i64: 1, 128>}, {pipeline_mode = #tpu.pipeline_mode<synchronous>, transform_indices = @transform_3, window_bounds = array<i64: 128, 128>}, {pipeline_mode = #tpu.pipeline_mode<synchronous>, transform_indices = @transform_4, window_bounds = array<i64: 1, 128>}, {transform_indices = @transform_5, window_bounds = array<i64: 4, 128>}]} {
    %c0 = arith.constant 0 : index
    %c0_0 = arith.constant 0 : index
    %0 = vector.load %arg1[%c0, %c0_0] : memref<4x128xf32, #tpu.memory_space<vmem>>, vector<4x128xf32>
    %cst = arith.constant 5.000000e-01 : f32
    %1 = vector.broadcast %cst : f32 to vector<4x128xf32>
    %2 = arith.mulf %1, %0 : vector<4x128xf32>
    %cst_1 = arith.constant 0.707106769 : f32
    %3 = vector.broadcast %cst_1 : f32 to vector<4x128xf32>
    %4 = arith.mulf %0, %3 : vector<4x128xf32>
    %5 = math.erf %4 : vector<4x128xf32>
    %cst_2 = arith.constant 1.000000e+00 : f32
    %6 = vector.broadcast %cst_2 : f32 to vector<4x128xf32>
    %7 = arith.addf %6, %5 : vector<4x128xf32>
    %8 = arith.mulf %2, %7 : vector<4x128xf32>
    %c0_3 = arith.constant 0 : index
    %c0_4 = arith.constant 0 : index
    %9 = vector.load %arg2[%c0_3, %c0_4] : memref<128x128xf32, #tpu.memory_space<vmem>>, vector<128x128xf32>
    %cst_5 = arith.constant dense<0.000000e+00> : vector<4x128xf32>
    %10 = tpu.matmul %8, %9, %cst_5 {dimension_numbers = #tpu.dot_dimension_numbers<[1], [0], [0], [1], [0, 0, 1, 1], [], []>} : vector<4x128xf32>, vector<128x128xf32>, vector<4x128xf32> -> vector<4x128xf32>
    %c0_6 = arith.constant 0 : index
    %c0_7 = arith.constant 0 : index
    %11 = vector.load %arg3[%c0_6, %c0_7] : memref<1x128xf32, #tpu.memory_space<vmem>>, vector<1x128xf32>
    %12 = vector.broadcast %11 : vector<1x128xf32> to vector<4x128xf32>
    %13 = arith.addf %10, %12 : vector<4x128xf32>
    %cst_8 = arith.constant 5.000000e-01 : f32
    %14 = vector.broadcast %cst_8 : f32 to vector<4x128xf32>
    %15 = arith.mulf %14, %13 : vector<4x128xf32>
    %cst_9 = arith.constant 0.707106769 : f32
    %16 = vector.broadcast %cst_9 : f32 to vector<4x128xf32>
    %17 = arith.mulf %13, %16 : vector<4x128xf32>
    %18 = math.erf %17 : vector<4x128xf32>
    %cst_10 = arith.constant 1.000000e+00 : f32
    %19 = vector.broadcast %cst_10 : f32 to vector<4x128xf32>
    %20 = arith.addf %19, %18 : vector<4x128xf32>
    %21 = arith.mulf %15, %20 : vector<4x128xf32>
    %c0_11 = arith.constant 0 : index
    %c0_12 = arith.constant 0 : index
    %22 = vector.load %arg4[%c0_11, %c0_12] : memref<128x128xf32, #tpu.memory_space<vmem>>, vector<128x128xf32>
    %cst_13 = arith.constant dense<0.000000e+00> : vector<4x128xf32>
    %23 = tpu.matmul %21, %22, %cst_13 {dimension_numbers = #tpu.dot_dimension_numbers<[1], [0], [0], [1], [0, 0, 1, 1], [], []>} : vector<4x128xf32>, vector<128x128xf32>, vector<4x128xf32> -> vector<4x128xf32>
    %c0_14 = arith.constant 0 : index
    %c0_15 = arith.constant 0 : index
    %24 = vector.load %arg5[%c0_14, %c0_15] : memref<1x128xf32, #tpu.memory_space<vmem>>, vector<1x128xf32>
    %25 = vector.broadcast %24 : vector<1x128xf32> to vector<4x128xf32>
    %26 = arith.addf %23, %25 : vector<4x128xf32>
    %27 = arith.addf %0, %26 : vector<4x128xf32>
    %c0_16 = arith.constant 0 : index
    %c0_17 = arith.constant 0 : index
    %28 = vector.load %arg6[%c0_16, %c0_17] : memref<4x128xf32, #tpu.memory_space<vmem>>, vector<4x128xf32>
    tpu.vector_store %arg6[%c0_16, %c0_17], %27 {strides = array<i32>} : memref<4x128xf32, #tpu.memory_space<vmem>>, vector<4x128xf32>,
    return
  }
  func.func @transform_0(%arg0: i32) -> (i32, i32) {
    %c0_i32 = arith.constant 0 : i32
    %c0_i32_0 = arith.constant 0 : i32
    return %arg0, %c0_i32 : i32, i32
  }
  func.func @transform_1(%arg0: i32) -> (i32, i32) {
    %c0_i32 = arith.constant 0 : i32
    %c0_i32_0 = arith.constant 0 : i32
    %c0_i32_1 = arith.constant 0 : i32
    return %c0_i32, %c0_i32_0 : i32, i32
  }
  func.func @transform_2(%arg0: i32) -> (i32, i32) {
    %c0_i32 = arith.constant 0 : i32
    %c0_i32_0 = arith.constant 0 : i32
    %c0_i32_1 = arith.constant 0 : i32
    return %c0_i32, %c0_i32_0 : i32, i32
  }
  func.func @transform_3(%arg0: i32) -> (i32, i32) {
    %c0_i32 = arith.constant 0 : i32
    %c0_i32_0 = arith.constant 0 : i32
    %c0_i32_1 = arith.constant 0 : i32
    return %c0_i32, %c0_i32_0 : i32, i32
  }
  func.func @transform_4(%arg0: i32) -> (i32, i32) {
    %c0_i32 = arith.constant 0 : i32
    %c0_i32_0 = arith.constant 0 : i32
    %c0_i32_1 = arith.constant 0 : i32
    return %c0_i32, %c0_i32_0 : i32, i32
  }
  func.func @transform_5(%arg0: i32) -> (i32, i32) {
    %c0_i32 = arith.constant 0 : i32
    %c0_i32_0 = arith.constant 0 : i32
    return %arg0, %c0_i32 : i32, i32
  }
}

</mosaic_0001>

<bundles_post_ra>
// kernel: tpu_custom_call.1
= control target key start
LH: loop header
LB: loop body
LE: loop exit
PB: predicated region body
PF: predicated region fallthrough
CT: control target
= control target key end

     0   :  { %10 = vsyncpa [#allocation3], 0  ;;  %s574_s0 = inlined_call_operand.hbm [shape: f32[4,128], index: 0, kind: input, shape index: {}]   ;;  %s575_s1 = inlined_call_operand.hbm [shape: f32[128,128], index: 1, kind: input, shape index: {}]   ;;  %s576_s2 = inlined_call_operand.vmem [shape: f32[1,128], index: 2, kind: input, shape index: {}]   ;;  %s577_s3 = inlined_call_operand.hbm [shape: f32[128,128], index: 3, kind: input, shape index: {}]   ;;  %s578_s4 = inlined_call_operand.vmem [shape: f32[1,128], index: 4, kind: input, shape index: {}]   ;;  %s579_s5 = inlined_call_operand.hbm [shape: f32[4,128], index: 5, kind: output, shape index: {}]  }
   0x1   :  { %11 = vsyncpa [#allocation6], 0 }
   0x2   :  { %12 = vsyncpa [#allocation4], 0  ;;  %s479_s18 = smov [#allocation5]  }
   0x3   :  { %s28_s19 = sshll.u32 %s479_s18, 4  ;;  %s29_s19 = int_to_ptr.vmem [resolvable:$true] %s28_s19 }
   0x4   :  { %s401_s20 = scalar_lea.vmem %s29_s19, 2048  ;;  %p406_p1 = scmp.lt.s32.totalorder %s29_s19, %s29_s19 }
   0x5   :  { %p402_p0 = scmp.ne.s32.totalorder %s29_s19, %s401_s20  ;;  %p407_p2 = scmp.lt.s32.totalorder %s401_s20, %s401_s20 }
   0x7   :  { %p408_p3 = por %p407_p2, %p406_p1 }
   0x9   :  { %p409_p4 = pnand %p408_p3, %p402_p0 }
   0xb   :  { %412 = shalt.err (!%p409_p4)
}
   0xc   :  { %s480_s21 = smov 128   ;;  %s481_s22 = smov 8  }
   0xd   :  { %34 = dma.hbm_to_vmem [thread:$0]  %s575_s1, 2048, %s29_s19, [#allocation6], %s480_s21, %s480_s21, %s481_s22  }
   0xe   :  { %s482_s25 = smov [#allocation2]   ;;  %s483_s27 = smov [#allocation7]  }
   0xf   :  { %s19_s26 = sshll.u32 %s482_s25, 4  ;;  %s42_s28 = sshll.u32 %s483_s27, 4  ;;  %s20_s26 = int_to_ptr.vmem [resolvable:$true] %s19_s26  ;;  %s43_s28 = int_to_ptr.vmem [resolvable:$true] %s42_s28 }
  0x10   :  { %s421_s29 = scalar_lea.vmem %s20_s26, 64  ;;  %p426_p6 = scmp.lt.s32.totalorder %s20_s26, %s20_s26 }
  0x11   :  { %p422_p5 = scmp.ne.s32.totalorder %s20_s26, %s421_s29  ;;  %p427_p7 = scmp.lt.s32.totalorder %s421_s29, %s421_s29 }
  0x13   :  { %p428_p8 = por %p427_p7, %p426_p6 }
  0x15   :  { %p429_p9 = pnand %p428_p8, %p422_p5 }
  0x17   :  { %432 = shalt.err (!%p429_p9)
}
  0x18   :  { %22 = dma.hbm_to_vmem [thread:$0]  %s574_s0, 64, %s20_s26, [#allocation3]  }
  0x19   :  { %s441_s7 = scalar_lea.vmem %s43_s28, 2048  ;;  %p446_p11 = scmp.lt.s32.totalorder %s43_s28, %s43_s28 }
  0x1a   :  { %p442_p10 = scmp.ne.s32.totalorder %s43_s28, %s441_s7  ;;  %p447_p12 = scmp.lt.s32.totalorder %s441_s7, %s441_s7 }
  0x1c   :  { %p448_p13 = por %p447_p12, %p446_p11 }
  0x1e   :  { %p449_p0 = pnand %p448_p13, %p442_p10 }
  0x20   :  { %452 = shalt.err (!%p449_p0)
}
  0x21   :  { %48 = dma.hbm_to_vmem [thread:$0]  %s577_s3, 2048, %s43_s28, [#allocation6], %s480_s21, %s480_s21, %s481_s22  }
  0x22   :  { %473 = dma.done.wait [#allocation3], 64  }
  0x23   :  { %474 = vsyncadd [#allocation3], 4294967232 }
  0x24   :  { %475 = dma.done.wait [#allocation6], 4096  }
  0x25   :  { %476 = vsyncadd [#allocation6], 4294963200  ;;  %v484_v0 = vmov 0.0   ;;  %vm485_vm0 = vmmov 0   ;;  %v81_v1 = vld [vmem:[#allocation5 + $0x78] sm:$0xff]  ;;  %v80_v2 = vld [vmem:[#allocation5 + $0x70] sm:$0xff] }
  0x26   :  { %311 = vmatprep.subr.mxu0 %v484_v0  ;;  %343 = vmatprep.mubr.msk.f32.mxu0 %vm485_vm0, %v484_v0  ;;  %v79_v3 = vld [vmem:[#allocation5 + $0x68] sm:$0xff]  ;;  %v78_v4 = vld [vmem:[#allocation5 + $0x60] sm:$0xff]  ;;  %v532_v5 = vld [vmem:[#allocation2] sm:$0xf]  ;;  %s486_s11 = smov [#allocation8]  }
  0x27   :  { %346 = vmatprep.subr.mxu1 %v484_v0  ;;  %378 = vmatprep.mubr.msk.f32.mxu1 %vm485_vm0, %v484_v0  ;;  %v179_v6 = vld [vmem:[#allocation7 + $0x78] sm:$0xff]  ;;  %v62_v8 = vmul.f32 0.70710677, %v532_v5  ;;  %v178_v9 = vld [vmem:[#allocation7 + $0x70] sm:$0xff]  ;;  %v177_v10 = vld [vmem:[#allocation7 + $0x68] sm:$0xff]  ;;  %v61_v22 = vmul.f32 0.5, %v532_v5 }
  0x28   :  { %312 = vmatpush3.msra.mxu0 %v81_v1  ;;  %v77_v7 = vld [vmem:[#allocation5 + $0x58] sm:$0xff]  ;;  %347 = vmatpush3.msra.mxu1 %v179_v6  ;;  %v76_v11 = vld [vmem:[#allocation5 + $0x50] sm:$0xff]  ;;  %v176_v12 = vld [vmem:[#allocation7 + $0x60] sm:$0xff]  ;;  %s265_s12 = sshll.u32 %s486_s11, 4  ;;  %s266_s12 = int_to_ptr.vmem [resolvable:$true] %s265_s12 }
  0x29   :  { %313 = vmatprep.subr.mxu0 %v484_v0  ;;  %348 = vmatprep.subr.mxu1 %v484_v0  ;;  %389 = verf.f32 %v62_v8  ;;  %v75_v13 = vld [vmem:[#allocation5 + $0x48] sm:$0xff]  ;;  %v74_v14 = vld [vmem:[#allocation5 + $0x40] sm:$0xff]  ;;  %v73_v15 = vld [vmem:[#allocation5 + $0x38] sm:$0xff]  ;;  %p458_p2 = scmp.lt.s32.totalorder %s266_s12, %s266_s12 }
  0x2a   :  { %314 = vmatpush3.msra.mxu0 %v80_v2  ;;  %349 = vmatpush3.msra.mxu1 %v178_v9  ;;  %v72_v16 = vld [vmem:[#allocation5 + $0x30] sm:$0xff]  ;;  %v71_v17 = vld [vmem:[#allocation5 + $0x28] sm:$0xff]  ;;  %v70_v18 = vld [vmem:[#allocation5 + $0x20] sm:$0xff] }
  0x2b   :  { %315 = vmatprep.subr.mxu0 %v484_v0  ;;  %350 = vmatprep.subr.mxu1 %v484_v0  ;;  %v69_v20 = vld [vmem:[#allocation5 + $0x18] sm:$0xff]  ;;  %v68_v21 = vld [vmem:[#allocation5 + $0x10] sm:$0xff]  ;;  %v67_v24 = vld [vmem:[#allocation5 + $0x8] sm:$0xff] }
  0x2c   :  { %316 = vmatpush3.msra.mxu0 %v79_v3  ;;  %351 = vmatpush3.msra.mxu1 %v177_v10  ;;  %v66_v25 = vld [vmem:[#allocation5] sm:$0xff]  ;;  %v175_v27 = vld [vmem:[#allocation7 + $0x58] sm:$0xff]  ;;  %v174_v28 = vld [vmem:[#allocation7 + $0x50] sm:$0xff] }
  0x2d   :  { %317 = vmatprep.subr.mxu0 %v484_v0  ;;  %352 = vmatprep.subr.mxu1 %v484_v0  ;;  %v173_v29 = vld [vmem:[#allocation7 + $0x48] sm:$0xff]  ;;  %v172_v30 = vld [vmem:[#allocation7 + $0x40] sm:$0xff]  ;;  %v171_v31 = vld [vmem:[#allocation7 + $0x38] sm:$0xff] }
  0x2e   :  { %318 = vmatpush3.msra.mxu0 %v78_v4  ;;  %353 = vmatpush3.msra.mxu1 %v176_v12  ;;  %v170_v32 = vld [vmem:[#allocation7 + $0x30] sm:$0xff]  ;;  %v169_v33 = vld [vmem:[#allocation7 + $0x28] sm:$0xff]  ;;  %v168_v34 = vld [vmem:[#allocation7 + $0x20] sm:$0xff] }
  0x2f   :  { %319 = vmatprep.subr.mxu0 %v484_v0  ;;  %354 = vmatprep.subr.mxu1 %v484_v0  ;;  %v167_v35 = vld [vmem:[#allocation7 + $0x18] sm:$0xff]  ;;  %v166_v36 = vld [vmem:[#allocation7 + $0x10] sm:$0xff]  ;;  %v165_v37 = vld [vmem:[#allocation7 + $0x8] sm:$0xff] }
  0x30   :  { %320 = vmatpush3.msra.mxu0 %v77_v7  ;;  %355 = vmatpush3.msra.mxu1 %v175_v27  ;;  %v164_v38 = vld [vmem:[#allocation7] sm:$0xff]  ;;  %v275_v39 = vld [vmem:[%s576_s2] ss:$0 sm:$0xff]  ;;  %s453_s2 = scalar_lea.vmem %s266_s12, 64 }
  0x31   :  { %321 = vmatprep.subr.mxu0 %v484_v0  ;;  %356 = vmatprep.subr.mxu1 %v484_v0  ;;  %v276_v48 = vld [vmem:[%s578_s4] ss:$0 sm:$0xff]  ;;  %p454_p1 = scmp.ne.s32.totalorder %s266_s12, %s453_s2  ;;  %p459_p3 = scmp.lt.s32.totalorder %s453_s2, %s453_s2 }
  0x32   :  { %322 = vmatpush3.msra.mxu0 %v76_v11  ;;  %357 = vmatpush3.msra.mxu1 %v174_v28 }
  0x33   :  { %323 = vmatprep.subr.mxu0 %v484_v0  ;;  %358 = vmatprep.subr.mxu1 %v484_v0  ;;  %p460_p4 = por %p459_p3, %p458_p2 }
  0x34   :  { %324 = vmatpush3.msra.mxu0 %v75_v13  ;;  %359 = vmatpush3.msra.mxu1 %v173_v29 }
  0x35   :  { %325 = vmatprep.subr.mxu0 %v484_v0  ;;  %360 = vmatprep.subr.mxu1 %v484_v0  ;;  %p461_p5 = pnand %p460_p4, %p454_p1 }
  0x36   :  { %326 = vmatpush3.msra.mxu0 %v74_v14  ;;  %v390_v19 = vpop.eup %389  ;;  %361 = vmatpush3.msra.mxu1 %v172_v30 }
  0x37   :  { %327 = vmatprep.subr.mxu0 %v484_v0  ;;  %v64_v23 = vadd.f32 1.0, %v390_v19  ;;  %362 = vmatprep.subr.mxu1 %v484_v0 }
  0x38   :  { %328 = vmatpush3.msra.mxu0 %v73_v15  ;;  %363 = vmatpush3.msra.mxu1 %v171_v31 }
  0x39   :  { %329 = vmatprep.subr.mxu0 %v484_v0  ;;  %v65_v26 = vmul.f32 %v64_v23, %v61_v22  ;;  %364 = vmatprep.subr.mxu1 %v484_v0 }
  0x3a   :  { %330 = vmatpush3.msra.mxu0 %v72_v16  ;;  %365 = vmatpush3.msra.mxu1 %v170_v32 }
  0x3b   :  { %331 = vmatprep.subr.mxu0 %v484_v0  ;;  %366 = vmatprep.subr.mxu1 %v484_v0 }
  0x3c   :  { %332 = vmatpush3.msra.mxu0 %v71_v17  ;;  %367 = vmatpush3.msra.mxu1 %v169_v33 }
  0x3d   :  { %333 = vmatprep.subr.mxu0 %v484_v0  ;;  %368 = vmatprep.subr.mxu1 %v484_v0 }
  0x3e   :  { %334 = vmatpush3.msra.mxu0 %v70_v18  ;;  %369 = vmatpush3.msra.mxu1 %v168_v34 }
  0x3f   :  { %335 = vmatprep.subr.mxu0 %v484_v0  ;;  %370 = vmatprep.subr.mxu1 %v484_v0 }
  0x40   :  { %336 = vmatpush3.msra.mxu0 %v69_v20  ;;  %371 = vmatpush3.msra.mxu1 %v167_v35 }
  0x41   :  { %337 = vmatprep.subr.mxu0 %v484_v0  ;;  %372 = vmatprep.subr.mxu1 %v484_v0 }
  0x42   :  { %338 = vmatpush3.msra.mxu0 %v68_v21  ;;  %373 = vmatpush3.msra.mxu1 %v166_v36 }
  0x43   :  { %339 = vmatprep.subr.mxu0 %v484_v0  ;;  %374 = vmatprep.subr.mxu1 %v484_v0 }
  0x44   :  { %340 = vmatpush3.msra.mxu0 %v67_v24  ;;  %375 = vmatpush3.msra.mxu1 %v165_v37 }
  0x45   :  { %341 = vmatprep.subr.mxu0 %v484_v0  ;;  %376 = vmatprep.subr.mxu1 %v484_v0 }
  0x46   :  { %342 = vmatpush3.msra.mxu0 %v66_v25  ;;  %377 = vmatpush3.msra.mxu1 %v164_v38 }
  0x47   :  { %344 = vmatmul.mubr.f32.vlgmr.msra.gmra.mxu0 %v65_v26 }
 0x107   :  { %v155_v40 = vpop.f32.mrf.mxu0 }
 0x108   :  { %v156_v41 = vadd.f32 %v275_v39, %v155_v40 }
 0x109   :  { %v345_v42 = vpop.f32.mrf.mxu0 }
 0x10a   :  { %v160_v43 = vmul.f32 0.70710677, %v156_v41  ;;  %v159_v45 = vmul.f32 0.5, %v156_v41 }
 0x10c   :  { %391 = verf.f32 %v160_v43 }
 0x119   :  { %v392_v44 = vpop.eup %391 }
 0x11a   :  { %v162_v46 = vadd.f32 1.0, %v392_v44 }
 0x11c   :  { %v163_v47 = vmul.f32 %v162_v46, %v159_v45 }
 0x11e   :  { %379 = vmatmul.mubr.f32.vlgmr.msra.gmra.mxu1 %v163_v47 }
 0x1de   :  { %v253_v49 = vpop.f32.mrf.mxu1 }
 0x1df   :  { %v254_v50 = vadd.f32 %v276_v48, %v253_v49 }
 0x1e0   :  { %v380_v51 = vpop.f32.mrf.mxu1 }
 0x1e1   :  { %v257_v52 = vadd.f32 %v254_v50, %v532_v5 }
 0x1e3   :  { %258 = vst [vmem:[#allocation8] sm:$0xf] %v257_v52 }
 0x1e4   :  { %464 = shalt.err (!%p461_p5)
}
 0x1e5   :  { %268 = dma.vmem_to_hbm [thread:$0]  %s266_s12, 64, %s579_s5, [#allocation4]  }
 0x1e6   :  { %477 = dma.done.wait [#allocation4], 64  }
 0x1e7   :  { %478 = vsyncadd [#allocation4], 4294967232 }
 0x1e8   :  { %272 = vsyncpa [#allocation3], 1 }
 0x1e9   :  { %273 = vsyncpa [#allocation6], 1 }
 0x1ea   :  { %274 = vsyncpa [#allocation4], 1 }

</bundles_post_ra>
